<compile_context>
chip_gen: v6e
topology: v6e:2x2x1
jax: 0.10.0
libtpu: 0.0.40
codegen_flags: <defaults>
</compile_context>

<pallas_src>
import jax
import jax.numpy as jnp
from jax.experimental import pallas as pl
from jax.experimental.pallas import tpu as pltpu


def _attention_kernel(x_ref, w1_ref, b1_ref, w2_ref, b2_ref, out_ref):
    # x_ref:  (TB, S, D) VMEM       — TB batch rows per grid step (native dtype)
    # w1_ref: (D, H)     VMEM
    # b1_ref: (1, H)     VMEM
    # w2_ref: (1, H)     VMEM       — second-linear weights, lane-dense row
    # b2_ref: (1,)       SMEM       — scalar bias
    # out_ref:(TB, D)    VMEM
    tb, s, d = x_ref.shape
    h_dim = w1_ref.shape[1]

    x = x_ref[...]                                        # (TB, S, D)
    x2 = x.reshape(tb * s, d)                             # free when S % 8 == 0

    # Linear 1 + tanh: one MXU matmul over all TB*S rows (f32 accumulation),
    # tanh on the EUP in f32.
    hidden = jnp.tanh(
        jnp.dot(x2, w1_ref[...], preferred_element_type=jnp.float32)
        + b1_ref[...].astype(jnp.float32)                 # broadcast (1, H)
    )                                                     # (TB*S, H) f32

    # Linear 2 (output width 1) on the VPU: lane-dense weight row, lane reduce.
    h3 = hidden.reshape(tb, s, h_dim)                     # (TB, S, H)
    w2_row = w2_ref[...].astype(jnp.float32).reshape(1, 1, h_dim)
    scores = jnp.sum(h3 * w2_row, axis=-1) + b2_ref[0]    # (TB, S), lane-dense

    # Softmax over the sequence axis (the lane axis), numerically stable, f32.
    m = jnp.max(scores, axis=-1, keepdims=True)           # (TB, 1)
    e = jnp.exp(scores - m)                               # (TB, S)
    attn = e * pl.reciprocal(jnp.sum(e, axis=-1, keepdims=True), approx=False)

    # Weighted sum over the sequence on the VPU/XLU (multiply + sublane
    # reduce); f32 accumulation. Avoids an M=1 batched MXU matmul.
    out = jnp.sum(x.astype(jnp.float32) * attn[:, :, None], axis=1)   # (TB, D)
    out_ref[...] = out.astype(out_ref.dtype)


def attention_layer(x, w1, b1, w2, b2, *, block_b=None):
    """x: (B, S, D); w1: (D, H); b1: (H,); w2: (H, 1); b2: (1,) -> (B, D)."""
    B, S, D = x.shape
    H = w1.shape[1]
    itemsize = jnp.dtype(x.dtype).itemsize

    # ---- VMEM budget: count intermediates, not just the x tile -------------
    try:
        vmem_cap = pltpu.get_tpu_info().vmem_capacity_bytes
    except Exception:
        vmem_cap = 64 << 20                      # v7x physical size; safe floor
    # Explicit scoped limit with headroom (v6e/v5e: 96 MiB, v7x: 48 MiB).
    vmem_limit = max(32 << 20, min(vmem_cap * 3 // 4, 96 << 20))

    # Per-grid-step live bytes per batch row:
    #   2x x tile (double-buffered DMA) + f32 working copy of x
    #   + (S, H) f32 hidden + scores/attn + double-buffered output row.
    per_row = (2 * S * D * itemsize) + (S * D * 4) + (S * H * 4) + (2 * S + 2 * D) * 4
    weight_bytes = 2 * (D * H + 2 * H) * 4       # double-buffered W1 / b1 / W2 (f32)
    budget = vmem_limit - weight_bytes - (4 << 20)   # headroom for scratch/regalloc

    if block_b is None:
        block_b = max(1, min(B, budget // per_row))
        # Split into >=2 grid steps only when each half still moves >= ~1 MiB
        # of x: that feeds v7x's two TensorCores; on 1-TC parts (v5e/v6e) the
        # extra ~0.35 us step is then negligible next to the DMA time.
        if block_b == B and B >= 2 and B * S * D * itemsize >= (2 << 20):
            block_b = pl.cdiv(B, 2)
        # Keep split output blocks sublane-aligned so stores stay unmasked.
        if block_b < B and block_b > 8:
            block_b = (block_b // 8) * 8
    grid_b = pl.cdiv(B, block_b)                 # partial last block is masked

    b1_2d = b1.reshape(1, H)
    w2_row = w2.reshape(1, H)                    # lane-dense second-linear weights
    b2_1d = b2.reshape(1).astype(jnp.float32)    # scalar, lives in SMEM

    return pl.pallas_call(
        _attention_kernel,
        out_shape=jax.ShapeDtypeStruct((B, D), x.dtype),
        grid_spec=pltpu.PrefetchScalarGridSpec(
            num_scalar_prefetch=0,
            grid=(grid_b,),
            in_specs=[
                pl.BlockSpec((block_b, S, D), lambda i: (i, 0, 0)),   # x tile
                pl.BlockSpec((D, H), lambda i: (0, 0)),               # W1 (full)
                pl.BlockSpec((1, H), lambda i: (0, 0)),               # b1 (full)
                pl.BlockSpec((1, H), lambda i: (0, 0)),               # W2 row (full)
                pl.BlockSpec(memory_space=pltpu.MemorySpace.SMEM),    # b2 scalar
            ],
            out_specs=pl.BlockSpec((block_b, D), lambda i: (i, 0)),
        ),
        compiler_params=pltpu.CompilerParams(
            dimension_semantics=("parallel",),
            vmem_limit_bytes=int(vmem_limit),
        ),
    )(x, w1, b1_2d, w2_row, b2_1d)


def attention_layer_ref(x, w1, b1, w2, b2):
    """Pure-JAX reference mirroring the PyTorch forward."""
    h = jnp.tanh(jnp.einsum("bsd,dh->bsh", x, w1) + b1)
    scores = jnp.einsum("bsh,ho->bso", h, w2) + b2            # (B, S, 1)
    attn = jax.nn.softmax(scores, axis=1)
    return jnp.sum(x * attn, axis=1)


if __name__ == "__main__":
    B, S, D, H = 2, 8, 32, 16

    key = jax.random.PRNGKey(0)
    kx, kw1, kb1, kw2, kb2 = jax.random.split(key, 5)

    x = jax.random.normal(kx, (B, S, D), dtype=jnp.float32)

    # Deterministic parameter init (PyTorch-style uniform +-1/sqrt(fan_in)).
    lim1 = 1.0 / (D ** 0.5)
    lim2 = 1.0 / (H ** 0.5)
    w1 = jax.random.uniform(kw1, (D, H), jnp.float32, -lim1, lim1)
    b1 = jax.random.uniform(kb1, (H,), jnp.float32, -lim1, lim1)
    w2 = jax.random.uniform(kw2, (H, 1), jnp.float32, -lim2, lim2)
    b2 = jax.random.uniform(kb2, (1,), jnp.float32, -lim2, lim2)

    out = attention_layer(x, w1, b1, w2, b2)
    out = jax.block_until_ready(out)

    ref = attention_layer_ref(x, w1, b1, w2, b2)
    assert out.shape == (B, D)
    assert jnp.allclose(out, ref, atol=1e-5, rtol=1e-5), "mismatch vs reference"

    print("KERNEL_OK")
</pallas_src>

<mosaic_0001>
module attributes {stable_mosaic.version = 11 : i64} {
  func.func @_attention_kernel(%arg0: i32, %arg1: memref<2x8x32xf32, #tpu.memory_space<vmem>>, %arg2: memref<32x16xf32, #tpu.memory_space<vmem>>, %arg3: memref<1x16xf32, #tpu.memory_space<vmem>>, %arg4: memref<1x16xf32, #tpu.memory_space<vmem>>, %arg5: memref<1xf32, #tpu.memory_space<smem>>, %arg6: memref<2x32xf32, #tpu.memory_space<vmem>>) attributes {dimension_semantics = [#tpu.dimension_semantics<parallel>], iteration_bounds = array<i64: 1>, scalar_prefetch = 0 : i64, scratch_operands = 0 : i64, tpu.core_type = #tpu.core_type<tc>, window_params = [{transform_indices = @transform_0, window_bounds = array<i64: 2, 8, 32>}, {pipeline_mode = #tpu.pipeline_mode<synchronous>, transform_indices = @transform_1, window_bounds = array<i64: 32, 16>}, {pipeline_mode = #tpu.pipeline_mode<synchronous>, transform_indices = @transform_2, window_bounds = array<i64: 1, 16>}, {pipeline_mode = #tpu.pipeline_mode<synchronous>, transform_indices = @transform_3, window_bounds = array<i64: 1, 16>}, {transform_indices = @transform_4, window_bounds = array<i64: 1>}, {transform_indices = @transform_5, window_bounds = array<i64: 2, 32>}]} {
    %c0 = arith.constant 0 : index
    %c0_0 = arith.constant 0 : index
    %c0_1 = arith.constant 0 : index
    %0 = vector.load %arg1[%c0, %c0_0, %c0_1] : memref<2x8x32xf32, #tpu.memory_space<vmem>>, vector<2x8x32xf32>
    %1 = vector.shape_cast %0 : vector<2x8x32xf32> to vector<16x32xf32>
    %c0_2 = arith.constant 0 : index
    %c0_3 = arith.constant 0 : index
    %2 = vector.load %arg2[%c0_2, %c0_3] : memref<32x16xf32, #tpu.memory_space<vmem>>, vector<32x16xf32>
    %cst = arith.constant dense<0.000000e+00> : vector<16x16xf32>
    %3 = tpu.matmul %1, %2, %cst {dimension_numbers = #tpu.dot_dimension_numbers<[1], [0], [0], [1], [0, 0, 1, 1], [], []>} : vector<16x32xf32>, vector<32x16xf32>, vector<16x16xf32> -> vector<16x16xf32>
    %c0_4 = arith.constant 0 : index
    %c0_5 = arith.constant 0 : index
    %4 = vector.load %arg3[%c0_4, %c0_5] : memref<1x16xf32, #tpu.memory_space<vmem>>, vector<1x16xf32>
    %5 = vector.broadcast %4 : vector<1x16xf32> to vector<16x16xf32>
    %6 = arith.addf %3, %5 : vector<16x16xf32>
    %7 = math.tanh %6 : vector<16x16xf32>
    %8 = vector.shape_cast %7 : vector<16x16xf32> to vector<2x8x16xf32>
    %c0_6 = arith.constant 0 : index
    %c0_7 = arith.constant 0 : index
    %9 = vector.load %arg4[%c0_6, %c0_7] : memref<1x16xf32, #tpu.memory_space<vmem>>, vector<1x16xf32>
    %10 = vector.shape_cast %9 : vector<1x16xf32> to vector<1x1x16xf32>
    %11 = vector.broadcast %10 : vector<1x1x16xf32> to vector<2x8x16xf32>
    %12 = arith.mulf %8, %11 : vector<2x8x16xf32>
    %cst_8 = arith.constant dense<0.000000e+00> : vector<2x8xf32>
    %13 = vector.multi_reduction <add>, %12, %cst_8 [2] : vector<2x8x16xf32> to vector<2x8xf32>
    %c0_9 = arith.constant 0 : index
    %14 = memref.load %arg5[%c0_9] : memref<1xf32, #tpu.memory_space<smem>>
    %15 = vector.broadcast %14 : f32 to vector<2x8xf32>
    %16 = arith.addf %13, %15 : vector<2x8xf32>
    %cst_10 = arith.constant dense<0xFF800000> : vector<2xf32>
    %17 = vector.multi_reduction <maximumf>, %16, %cst_10 [1] : vector<2x8xf32> to vector<2xf32>
    %18 = vector.shape_cast %17 : vector<2xf32> to vector<2x1xf32>
    %19 = vector.broadcast %18 : vector<2x1xf32> to vector<2x8xf32>
    %20 = arith.subf %16, %19 : vector<2x8xf32>
    %21 = math.exp %20 : vector<2x8xf32>
    %cst_11 = arith.constant dense<0.000000e+00> : vector<2xf32>
    %22 = vector.multi_reduction <add>, %21, %cst_11 [1] : vector<2x8xf32> to vector<2xf32>
    %23 = vector.shape_cast %22 : vector<2xf32> to vector<2x1xf32>
    %24 = tpu.reciprocal %23 : vector<2x1xf32> -> vector<2x1xf32>
    %25 = vector.broadcast %24 : vector<2x1xf32> to vector<2x8xf32>
    %26 = arith.mulf %21, %25 : vector<2x8xf32>
    %27 = vector.shape_cast %26 : vector<2x8xf32> to vector<2x8x1xf32>
    %28 = vector.broadcast %27 : vector<2x8x1xf32> to vector<2x8x32xf32>
    %29 = arith.mulf %0, %28 : vector<2x8x32xf32>
    %cst_12 = arith.constant dense<0.000000e+00> : vector<2x32xf32>
    %30 = vector.multi_reduction <add>, %29, %cst_12 [1] : vector<2x8x32xf32> to vector<2x32xf32>
    %c0_13 = arith.constant 0 : index
    %c0_14 = arith.constant 0 : index
    %31 = vector.load %arg6[%c0_13, %c0_14] : memref<2x32xf32, #tpu.memory_space<vmem>>, vector<2x32xf32>
    tpu.vector_store %arg6[%c0_13, %c0_14], %30 {strides = array<i32>} : memref<2x32xf32, #tpu.memory_space<vmem>>, vector<2x32xf32>,
    return
  }
  func.func @transform_0(%arg0: i32) -> (i32, i32, i32) {
    %c0_i32 = arith.constant 0 : i32
    %c0_i32_0 = arith.constant 0 : i32
    %c0_i32_1 = arith.constant 0 : i32
    return %arg0, %c0_i32, %c0_i32_0 : i32, i32, i32
  }
  func.func @transform_1(%arg0: i32) -> (i32, i32) {
    %c0_i32 = arith.constant 0 : i32
    %c0_i32_0 = arith.constant 0 : i32
    %c0_i32_1 = arith.constant 0 : i32
    return %c0_i32, %c0_i32_0 : i32, i32
  }
  func.func @transform_2(%arg0: i32) -> (i32, i32) {
    %c0_i32 = arith.constant 0 : i32
    %c0_i32_0 = arith.constant 0 : i32
    %c0_i32_1 = arith.constant 0 : i32
    return %c0_i32, %c0_i32_0 : i32, i32
  }
  func.func @transform_3(%arg0: i32) -> (i32, i32) {
    %c0_i32 = arith.constant 0 : i32
    %c0_i32_0 = arith.constant 0 : i32
    %c0_i32_1 = arith.constant 0 : i32
    return %c0_i32, %c0_i32_0 : i32, i32
  }
  func.func @transform_4(%arg0: i32) -> i32 {
    %c0_i32 = arith.constant 0 : i32
    %c0_i32_0 = arith.constant 0 : i32
    return %c0_i32 : i32
  }
  func.func @transform_5(%arg0: i32) -> (i32, i32) {
    %c0_i32 = arith.constant 0 : i32
    %c0_i32_0 = arith.constant 0 : i32
    return %arg0, %c0_i32 : i32, i32
  }
}

</mosaic_0001>

<bundles_post_ra>
// kernel: tpu_custom_call.1
= control target key start
LH: loop header
LB: loop body
LE: loop exit
PB: predicated region body
PF: predicated region fallthrough
CT: control target
= control target key end

     0   :  { %vm35_vm0 = vcmask 261120   ;;  %s392_s0 = inlined_call_operand.vmem [shape: f32[2,8,32], index: 0, kind: input, shape index: {}]   ;;  %s393_s1 = inlined_call_operand.vmem [shape: f32[32,16], index: 1, kind: input, shape index: {}]   ;;  %s394_s2 = inlined_call_operand.vmem [shape: f32[1,16], index: 2, kind: input, shape index: {}]   ;;  %s395_s3 = inlined_call_operand.vmem [shape: f32[1,16], index: 3, kind: input, shape index: {}]   ;;  %s396_s4 = inlined_call_operand.<no memory space> [shape: f32[1], index: 4, kind: input, shape index: {}]   ;;  %s397_s5 = inlined_call_operand.hbm [shape: f32[2,32], index: 5, kind: output, shape index: {}]  }
   0x1   :  { %v27_v0 = vld [vmem:[%s393_s1 + $0x18] sm:$0xff]  ;;  %v26_v1 = vld [vmem:[%s393_s1 + $0x10] sm:$0xff]  ;;  %v354_v2 = vld [vmem:[%s392_s0] sm:$0xff] }
   0x2   :  { %266 = vmatprep.subr.mxu0 %v27_v0  ;;  %v25_v3 = vld [vmem:[%s393_s1 + $0x8] sm:$0xff]  ;;  %274 = vmatprep.mubr.msk.f32.mxu0 %vm35_vm0, %v354_v2 }
   0x3   :  { %267 = vmatpush3.msra.mxu0 %v27_v0 }
   0x4   :  { %11 = vsyncpa [#allocation4], 0  ;;  %268 = vmatprep.subr.mxu0 %v26_v1  ;;  %v24_v4 = vld [vmem:[%s393_s1] sm:$0xff]  ;;  %v367_v5 = vld [vmem:[%s392_s0 + $0x8] sm:$0xff]  ;;  %vm128_vm1 = vcmask 130048   ;;  %v141_v18 = vlaneseq  ;;  %v136_v21 = vstv %s396_s4  ;;  %vm151_vm2 = vcmask 1041409  }
   0x5   :  { %269 = vmatpush3.msra.mxu0 %v26_v1  ;;  %v256_v6 = vld [vmem:[%s394_s2] ss:$0 sm:$0xff]  ;;  %vm154_vm3 = vcmask 58368   ;;  %v313_v31 = vmov 0   ;;  %vm240_vm4 = vcmask 254976  }
   0x6   :  { %270 = vmatprep.subr.mxu0 %v25_v3  ;;  %v259_v13 = vld [vmem:[%s395_s3] ss:$0 sm:$0xff]  ;;  %v142_v19 = vand.u32 127, %v141_v18  ;;  %v144_v20 = vshrl.u32 %v141_v18, 7  ;;  %280 = vset.pattern.permute.xlu0 %v313_v31  ;;  %s314_s3 = smov [#allocation3]  }
   0x7   :  { %271 = vmatpush3.msra.mxu0 %v25_v3  ;;  %279 = vset.pattern.permute.xlu1 %v313_v31  ;;  %s248_s4 = sshll.u32 %s314_s3, 4  ;;  %s249_s4 = int_to_ptr.vmem [resolvable:$true] %s248_s4 }
   0x8   :  { %272 = vmatprep.subr.mxu0 %v24_v4  ;;  %v145_v23 = vsub.s32 %v142_v19, %v144_v20  ;;  %v161_v32 = vsub.s32 0, %v144_v20  ;;  %v165_v33 = vsub.s32 1, %v144_v20  ;;  %s291_s8 = scalar_lea.vmem %s249_s4, 32  ;;  %p296_p1 = scmp.lt.s32.totalorder %s249_s4, %s249_s4 }
   0x9   :  { %273 = vmatpush3.msra.mxu0 %v24_v4  ;;  %p292_p0 = scmp.ne.s32.totalorder %s249_s4, %s291_s8  ;;  %p297_p2 = scmp.lt.s32.totalorder %s291_s8, %s291_s8 }
   0xa   :  { %275 = vmatmul.mubr.msk.f32.vlgmr.msra.gmra.mxu0 %vm35_vm0, %v367_v5 }
   0xb   :  { %p298_p3 = por %p297_p2, %p296_p1 }
   0xd   :  { %p299_p4 = pnand %p298_p3, %p292_p0 }
  0xca   :  { %v276_v7 = vpop.f32.mrf.mxu0 }
  0xcb   :  { %v114_v8 = vadd.f32 %v276_v7, %v256_v6 }
  0xcc   :  { %v108_v9 = vpop.f32.mrf.mxu0 }
  0xcd   :  { %v109_v10 = vadd.f32 %v256_v6, %v108_v9  ;;  %281 = vtanh.f32 %v114_v8 }
  0xcf   :  { %283 = vtanh.f32 %v109_v10 }
  0xda   :  { %v282_v11 = vpop.eup %281 }
  0xdb   :  { %v127_v16 = vmul.f32 %v282_v11, %v259_v13 }
  0xdc   :  { %v284_v12 = vpop.eup %283 }
  0xdd   :  { %v126_v14 = vmul.f32 %v284_v12, %v259_v13  ;;  %v132_v17 = vsel %vm128_vm1, %v127_v16, 0.0 }
  0xdf   :  { %v129_v15 = vsel %vm128_vm1, %v126_v14, 0.0 }
  0xe0   :  { %130 = vadd.xlane.f32.xlu0 %v129_v15 }
  0xe4   :  { %133 = vadd.xlane.f32.xlu0 %v132_v17 }
 0x169   :  { %v131_v22 = vpop.xlane.xlu0 %130 }
 0x16a   :  { %v137_v24 = vadd.f32 %v136_v21, %v131_v22 }
 0x16c   :  { %v146_v27 = vrot.slane %v137_v24, %v145_v23 }
 0x16d   :  { %v134_v25 = vpop.xlane.xlu0 %133 }
 0x16e   :  { %v138_v26 = vadd.f32 %v136_v21, %v134_v25 }
 0x170   :  { %v150_v28 = vrot.slane %v138_v26, %v145_v23 }
 0x172   :  { %v152_v29 = vsel %vm151_vm2, %v150_v28, %v146_v27 }
 0x173   :  { %v155_v30 = vsel %vm154_vm3, %v152_v29, -inf }
 0x174   :  { %156 = vmax.xlane.f32.xlu1 %v155_v30 }
 0x1fd   :  { %v157_v34 = vpop.xlane.xlu1 %156 }
 0x1fe   :  { %v162_v35 = vrot.slane %v157_v34, %v161_v32  ;;  %v166_v36 = vrot.slane %v157_v34, %v165_v33 }
 0x200   :  { %v169_v37 = vsub.f32 %v137_v24, %v162_v35  ;;  %v170_v38 = vsub.f32 %v138_v26, %v166_v36 }
 0x202   :  { %v171_v39 = vmul.f32 1.442695, %v169_v37  ;;  %v173_v40 = vmul.f32 1.442695, %v170_v38 }
 0x204   :  { %285 = vpow2.f32 %v171_v39 }
 0x205   :  { %287 = vpow2.f32 %v173_v40 }
 0x211   :  { %v286_v41 = vpop.eup %285 }
 0x212   :  { %v288_v42 = vpop.eup %287  ;;  %178 = vperm.xlu1 %279, %v286_v41  }
 0x213   :  { %181 = vperm.xlu0 %280, %v288_v42  }
 0x28d   :  { %v179_v43 = vpop.permute.xlu1 %178 }
 0x28e   :  { %v182_v44 = vpop.permute.xlu0 %181  ;;  %v186_v45 = vrot.slane %v179_v43, %v145_v23 }
 0x28f   :  { %v190_v46 = vrot.slane %v182_v44, %v145_v23 }
 0x291   :  { %v191_v47 = vsel %vm151_vm2, %v190_v46, %v186_v45 }
 0x292   :  { %v193_v48 = vsel %vm154_vm3, %v191_v47, 0.0 }
 0x293   :  { %194 = vadd.xlane.f32.xlu1 %v193_v48 }
 0x31c   :  { %v195_v49 = vpop.xlane.xlu1 %194 }
 0x31d   :  { %289 = vrcp.f32 %v195_v49 }
 0x32a   :  { %v290_v50 = vpop.eup %289 }
 0x32b   :  { %v201_v51 = vrot.slane %v290_v50, %v161_v32  ;;  %v205_v53 = vrot.slane %v290_v50, %v165_v33 }
 0x32d   :  { %v208_v52 = vmul.f32 %v286_v41, %v201_v51  ;;  %v209_v54 = vmul.f32 %v288_v42, %v205_v53 }
 0x32f   :  { %212 = vperm.xlu0 %280, %v208_v52  }
 0x333   :  { %217 = vperm.xlu0 %280, %v209_v54  }
 0x3aa   :  { %v213_v55 = vpop.permute.xlu0 %212 }
 0x3ab   :  { %v220_v56 = vmul.f32 %v213_v55, %v354_v2 }
 0x3ad   :  { %v222_v57 = vsel %vm35_vm0, %v220_v56, 0.0 }
 0x3ae   :  { %v223_v58 = vrot.slane %v222_v57, 4  ;;  %v218_v59 = vpop.permute.xlu0 %217 }
 0x3af   :  { %v221_v60 = vmul.f32 %v218_v59, %v367_v5 }
 0x3b0   :  { %v224_v61 = vadd.f32 %v223_v58, %v222_v57 }
 0x3b1   :  { %v229_v62 = vsel %vm35_vm0, %v221_v60, 0.0 }
 0x3b2   :  { %v225_v63 = vrot.slane %v224_v61, 2  ;;  %v230_v0 = vrot.slane %v229_v62, 4 }
 0x3b4   :  { %v226_v1 = vadd.f32 %v225_v63, %v224_v61  ;;  %v231_v3 = vadd.f32 %v230_v0, %v229_v62 }
 0x3b6   :  { %v232_v4 = vrot.slane %v231_v3, 2  ;;  %v227_v6 = vrot.slane %v226_v1, 1 }
 0x3b8   :  { %v233_v7 = vadd.f32 %v232_v4, %v231_v3  ;;  %v228_v2 = vadd.f32 %v227_v6, %v226_v1 }
 0x3ba   :  { %v234_v8 = vrot.slane %v233_v7, 1 }
 0x3bc   :  { %v235_v9 = vadd.f32 %v234_v8, %v233_v7 }
 0x3be   :  { %v238_v10 = vsel %vm151_vm2, %v235_v9, %v228_v2 }
 0x3bf   :  { %241 = vst.msk [vmem:[#allocation3] sm:$0x3] %vm240_vm4, %v238_v10 }
 0x3c0   :  { %302 = shalt.err (!%p299_p4)
}
 0x3c1   :  { %251 = dma.vmem_to_hbm [thread:$0]  %s249_s4, 32, %s397_s5, [#allocation4]  }
 0x3c2   :  { %311 = dma.done.wait [#allocation4], 32  }
 0x3c3   :  { %312 = vsyncadd [#allocation4], 4294967264 }
 0x3c4   :  { %255 = vsyncpa [#allocation4], 1 }

</bundles_post_ra>
